<compile_context>
chip_gen: v7x
topology: tpu7x:2x2x1
jax: 0.10.0
libtpu: 0.0.40
codegen_flags: <defaults>
</compile_context>

<pallas_src>
import jax
import jax.numpy as jnp
import numpy as np
from jax import lax
from jax.experimental import pallas as pl
from jax.experimental.pallas import tpu as pltpu


def _round_up(x: int, m: int) -> int:
    return (x + m - 1) // m * m


def _cdiv(a: int, b: int) -> int:
    return -(-a // b)


def _make_kernel(in_features: int):
    """Kernel closure; `in_features` (=310) is the unpadded K of fc1."""

    def kernel(x_ref, w1_ref, b1_ref, w2_ref, b2_ref, o_ref, xpad_ref):
        # Lane-pad the 310-wide x tile to 384 inside VMEM.  Zero + masked
        # sub-store every step: cheap (VMEM-only) and megacore-safe.
        xpad_ref[...] = jnp.zeros_like(xpad_ref)
        xpad_ref[:, :in_features] = x_ref[...]
        # fc1 + ReLU
        h = jnp.dot(xpad_ref[...], w1_ref[...], preferred_element_type=jnp.float32)
        h = jnp.maximum(h + b1_ref[...], 0.0)
        # fc2 + ReLU
        y = jnp.dot(h, w2_ref[...], preferred_element_type=jnp.float32)
        o_ref[...] = jnp.maximum(y + b2_ref[...], 0.0)

    return kernel


def prepare_params(w1, b1, w2, b2):
    """Pad weights/biases ONCE (call at model init, not per forward).

    w1: (310, H1); b1: (H1,); w2: (H1, H2); b2: (H2,).
    Zero-padding feature dims to multiples of 128 is exact for Linear+ReLU.
    """
    IN, H1 = w1.shape
    H1b, H2 = w2.shape
    assert H1b == H1
    IN_p = _round_up(IN, 128)
    H1_p = _round_up(H1, 128)
    H2_p = _round_up(H2, 128)
    f32 = jnp.float32
    w1p = jnp.zeros((IN_p, H1_p), f32).at[:IN, :H1].set(w1.astype(f32))
    b1p = jnp.zeros((1, H1_p), f32).at[:, :H1].set(b1.reshape(1, -1).astype(f32))
    w2p = jnp.zeros((H1_p, H2_p), f32).at[:H1, :H2].set(w2.astype(f32))
    b2p = jnp.zeros((1, H2_p), f32).at[:, :H2].set(b2.reshape(1, -1).astype(f32))
    return {"w1": w1p, "b1": b1p, "w2": w2p, "b2": b2p,
            "in_features": IN, "h1": H1, "h2": H2}


def feature_extractor_forward(x, params, *, max_block_b=1024, return_padded=False):
    """x: (B, 310); params from prepare_params().  Returns (B, H2) f32."""
    w1p, b1p, w2p, b2p = params["w1"], params["b1"], params["w2"], params["b2"]
    IN = params["in_features"]
    H2 = params["h2"]
    B, in_dim = x.shape
    assert in_dim == IN, f"expected {IN} input features, got {in_dim}"
    IN_p, H1_p = w1p.shape
    H2_p = w2p.shape[1]

    # ---- batch tiling: bound padding waste; keep >=2 (even) grid steps for
    # large batches so v7x's two TensorCores both get work.
    B8 = _round_up(B, 8)
    n_steps = max(1, _cdiv(B8, max_block_b))
    if B8 >= 1024:
        n_steps = max(2, n_steps)
        if n_steps % 2:
            n_steps += 1
    bb = _round_up(_cdiv(B8, n_steps), 8)
    B_p = bb * n_steps

    xf = x.astype(jnp.float32)
    if B_p != B:
        # Only batch rows are padded; feature dim stays at 310 (no lane-pad
        # round-trip through HBM). Padded rows compute garbage that is never
        # returned (intentional).
        xf = jnp.pad(xf, ((0, B_p - B), (0, 0)))

    flops = 2 * B_p * (IN_p * H1_p + H1_p * H2_p)
    bytes_accessed = 4 * (B_p * IN + IN_p * H1_p + H1_p
                          + H1_p * H2_p + H2_p + B_p * H2_p)

    out = pl.pallas_call(
        _make_kernel(IN),
        out_shape=jax.ShapeDtypeStruct((B_p, H2_p), jnp.float32),
        grid_spec=pltpu.PrefetchScalarGridSpec(
            num_scalar_prefetch=0,
            grid=(n_steps,),
            in_specs=[
                pl.BlockSpec((bb, IN), lambda i: (i, 0)),       # x tile (native 310 wide)
                pl.BlockSpec((IN_p, H1_p), lambda i: (0, 0)),   # W1 (VMEM-resident)
                pl.BlockSpec((1, H1_p), lambda i: (0, 0)),      # b1
                pl.BlockSpec((H1_p, H2_p), lambda i: (0, 0)),   # W2 (VMEM-resident)
                pl.BlockSpec((1, H2_p), lambda i: (0, 0)),      # b2
            ],
            out_specs=pl.BlockSpec((bb, H2_p), lambda i: (i, 0)),
            scratch_shapes=[pltpu.VMEM((bb, IN_p), jnp.float32)],  # lane-padded x
        ),
        compiler_params=pltpu.CompilerParams(
            dimension_semantics=("parallel",),          # megacore sharding on v7x
            vmem_limit_bytes=32 * 1024 * 1024,          # above v5e's 16 MiB default
        ),
        cost_estimate=pl.CostEstimate(
            flops=flops, transcendentals=0, bytes_accessed=bytes_accessed),
    )(xf, w1p, b1p, w2p, b2p)

    if return_padded:
        return out          # (B_p, H2_p) lane-dense layout, pad columns/rows are garbage/zeros
    return out[:B, :H2]


def feature_extractor_ref(x, w1, b1, w2, b2):
    """Pure-JAX reference mirroring the PyTorch forward (eval mode)."""
    h = jnp.maximum(jnp.dot(x, w1, precision=lax.Precision.HIGHEST) + b1, 0.0)
    return jnp.maximum(jnp.dot(h, w2, precision=lax.Precision.HIGHEST) + b2, 0.0)


if __name__ == "__main__":
    # Small shapes consistent with the module: nn.Linear(310, hidden_1) fixes
    # the input feature dim at 310.
    B = 16            # batch
    IN = 310          # input features (fixed by the module)
    H1, H2 = 64, 32   # hidden_1, hidden_2

    key = jax.random.PRNGKey(0)
    k_x, k_w1, k_b1, k_w2, k_b2 = jax.random.split(key, 5)

    x = jax.random.normal(k_x, (B, IN), jnp.float32)
    w1 = jax.random.normal(k_w1, (IN, H1), jnp.float32) * 0.05
    b1 = jax.random.normal(k_b1, (H1,), jnp.float32) * 0.05
    w2 = jax.random.normal(k_w2, (H1, H2), jnp.float32) * 0.05
    b2 = jax.random.normal(k_b2, (H2,), jnp.float32) * 0.05

    params = prepare_params(w1, b1, w2, b2)        # padded once, reused per call
    out = feature_extractor_forward(x, params)
    out = jax.block_until_ready(out)

    ref = feature_extractor_ref(x, w1, b1, w2, b2)
    np.testing.assert_allclose(np.asarray(out), np.asarray(ref),
                               rtol=1e-4, atol=1e-4)

    print("KERNEL_OK")
</pallas_src>

<mosaic_0001>
module attributes {stable_mosaic.version = 11 : i64} {
  func.func @kernel(%arg0: i32, %arg1: memref<16x310xf32, #tpu.memory_space<vmem>>, %arg2: memref<384x128xf32, #tpu.memory_space<vmem>>, %arg3: memref<1x128xf32, #tpu.memory_space<vmem>>, %arg4: memref<128x128xf32, #tpu.memory_space<vmem>>, %arg5: memref<1x128xf32, #tpu.memory_space<vmem>>, %arg6: memref<16x128xf32, #tpu.memory_space<vmem>>, %arg7: memref<16x384xf32, #tpu.memory_space<vmem>>) attributes {dimension_semantics = [#tpu.dimension_semantics<parallel>], iteration_bounds = array<i64: 1>, scalar_prefetch = 0 : i64, scratch_operands = 1 : i64, tpu.core_type = #tpu.core_type<tc>, window_params = [{transform_indices = @transform_0, window_bounds = array<i64: 16, 310>}, {pipeline_mode = #tpu.pipeline_mode<synchronous>, transform_indices = @transform_1, window_bounds = array<i64: 384, 128>}, {pipeline_mode = #tpu.pipeline_mode<synchronous>, transform_indices = @transform_2, window_bounds = array<i64: 1, 128>}, {pipeline_mode = #tpu.pipeline_mode<synchronous>, transform_indices = @transform_3, window_bounds = array<i64: 128, 128>}, {pipeline_mode = #tpu.pipeline_mode<synchronous>, transform_indices = @transform_4, window_bounds = array<i64: 1, 128>}, {transform_indices = @transform_5, window_bounds = array<i64: 16, 128>}]} {
    %cst = arith.constant 0.000000e+00 : f32
    %0 = vector.broadcast %cst : f32 to vector<16x384xf32>
    %c0 = arith.constant 0 : index
    %c0_0 = arith.constant 0 : index
    %1 = vector.load %arg7[%c0, %c0_0] : memref<16x384xf32, #tpu.memory_space<vmem>>, vector<16x384xf32>
    tpu.vector_store %arg7[%c0, %c0_0], %0 {strides = array<i32>} : memref<16x384xf32, #tpu.memory_space<vmem>>, vector<16x384xf32>,
    %c0_1 = arith.constant 0 : index
    %c0_2 = arith.constant 0 : index
    %2 = vector.load %arg1[%c0_1, %c0_2] : memref<16x310xf32, #tpu.memory_space<vmem>>, vector<16x310xf32>
    %c0_3 = arith.constant 0 : index
    %c0_4 = arith.constant 0 : index
    %3 = vector.load %arg7[%c0_3, %c0_4] : memref<16x384xf32, #tpu.memory_space<vmem>>, vector<16x310xf32>
    tpu.vector_store %arg7[%c0_3, %c0_4], %2 {strides = array<i32>} : memref<16x384xf32, #tpu.memory_space<vmem>>, vector<16x310xf32>,
    %c0_5 = arith.constant 0 : index
    %c0_6 = arith.constant 0 : index
    %4 = vector.load %arg7[%c0_5, %c0_6] : memref<16x384xf32, #tpu.memory_space<vmem>>, vector<16x384xf32>
    %c0_7 = arith.constant 0 : index
    %c0_8 = arith.constant 0 : index
    %5 = vector.load %arg2[%c0_7, %c0_8] : memref<384x128xf32, #tpu.memory_space<vmem>>, vector<384x128xf32>
    %cst_9 = arith.constant dense<0.000000e+00> : vector<16x128xf32>
    %6 = tpu.matmul %4, %5, %cst_9 {dimension_numbers = #tpu.dot_dimension_numbers<[1], [0], [0], [1], [0, 0, 1, 1], [], []>} : vector<16x384xf32>, vector<384x128xf32>, vector<16x128xf32> -> vector<16x128xf32>
    %c0_10 = arith.constant 0 : index
    %c0_11 = arith.constant 0 : index
    %7 = vector.load %arg3[%c0_10, %c0_11] : memref<1x128xf32, #tpu.memory_space<vmem>>, vector<1x128xf32>
    %8 = vector.broadcast %7 : vector<1x128xf32> to vector<16x128xf32>
    %9 = arith.addf %6, %8 : vector<16x128xf32>
    %cst_12 = arith.constant 0.000000e+00 : f32
    %10 = vector.broadcast %cst_12 : f32 to vector<16x128xf32>
    %11 = arith.maximumf %9, %10 : vector<16x128xf32>
    %c0_13 = arith.constant 0 : index
    %c0_14 = arith.constant 0 : index
    %12 = vector.load %arg4[%c0_13, %c0_14] : memref<128x128xf32, #tpu.memory_space<vmem>>, vector<128x128xf32>
    %cst_15 = arith.constant dense<0.000000e+00> : vector<16x128xf32>
    %13 = tpu.matmul %11, %12, %cst_15 {dimension_numbers = #tpu.dot_dimension_numbers<[1], [0], [0], [1], [0, 0, 1, 1], [], []>} : vector<16x128xf32>, vector<128x128xf32>, vector<16x128xf32> -> vector<16x128xf32>
    %c0_16 = arith.constant 0 : index
    %c0_17 = arith.constant 0 : index
    %14 = vector.load %arg5[%c0_16, %c0_17] : memref<1x128xf32, #tpu.memory_space<vmem>>, vector<1x128xf32>
    %15 = vector.broadcast %14 : vector<1x128xf32> to vector<16x128xf32>
    %16 = arith.addf %13, %15 : vector<16x128xf32>
    %cst_18 = arith.constant 0.000000e+00 : f32
    %17 = vector.broadcast %cst_18 : f32 to vector<16x128xf32>
    %18 = arith.maximumf %16, %17 : vector<16x128xf32>
    %c0_19 = arith.constant 0 : index
    %c0_20 = arith.constant 0 : index
    %19 = vector.load %arg6[%c0_19, %c0_20] : memref<16x128xf32, #tpu.memory_space<vmem>>, vector<16x128xf32>
    tpu.vector_store %arg6[%c0_19, %c0_20], %18 {strides = array<i32>} : memref<16x128xf32, #tpu.memory_space<vmem>>, vector<16x128xf32>,
    return
  }
  func.func @transform_0(%arg0: i32) -> (i32, i32) {
    %c0_i32 = arith.constant 0 : i32
    %c0_i32_0 = arith.constant 0 : i32
    return %arg0, %c0_i32 : i32, i32
  }
  func.func @transform_1(%arg0: i32) -> (i32, i32) {
    %c0_i32 = arith.constant 0 : i32
    %c0_i32_0 = arith.constant 0 : i32
    %c0_i32_1 = arith.constant 0 : i32
    return %c0_i32, %c0_i32_0 : i32, i32
  }
  func.func @transform_2(%arg0: i32) -> (i32, i32) {
    %c0_i32 = arith.constant 0 : i32
    %c0_i32_0 = arith.constant 0 : i32
    %c0_i32_1 = arith.constant 0 : i32
    return %c0_i32, %c0_i32_0 : i32, i32
  }
  func.func @transform_3(%arg0: i32) -> (i32, i32) {
    %c0_i32 = arith.constant 0 : i32
    %c0_i32_0 = arith.constant 0 : i32
    %c0_i32_1 = arith.constant 0 : i32
    return %c0_i32, %c0_i32_0 : i32, i32
  }
  func.func @transform_4(%arg0: i32) -> (i32, i32) {
    %c0_i32 = arith.constant 0 : i32
    %c0_i32_0 = arith.constant 0 : i32
    %c0_i32_1 = arith.constant 0 : i32
    return %c0_i32, %c0_i32_0 : i32, i32
  }
  func.func @transform_5(%arg0: i32) -> (i32, i32) {
    %c0_i32 = arith.constant 0 : i32
    %c0_i32_0 = arith.constant 0 : i32
    return %arg0, %c0_i32 : i32, i32
  }
}

</mosaic_0001>

<bundles_post_ra>
// kernel: tpu_custom_call.1
= control target key start
LH: loop header
LB: loop body
LE: loop exit
PB: predicated region body
PF: predicated region fallthrough
CT: control target
= control target key end

     0   :  { %10 = vsyncpa [#allocation4], 0  ;;  %s863_s0 = inlined_call_operand.hbm [shape: f32[16,310], index: 0, kind: input, shape index: {}]   ;;  %s864_s1 = inlined_call_operand.hbm [shape: f32[384,128], index: 1, kind: input, shape index: {}]   ;;  %s865_s2 = inlined_call_operand.vmem [shape: f32[1,128], index: 2, kind: input, shape index: {}]   ;;  %s866_s3 = inlined_call_operand.hbm [shape: f32[128,128], index: 3, kind: input, shape index: {}]   ;;  %s867_s4 = inlined_call_operand.vmem [shape: f32[1,128], index: 4, kind: input, shape index: {}]   ;;  %s868_s5 = inlined_call_operand.hbm [shape: f32[16,128], index: 5, kind: output, shape index: {}]  }
   0x1   :  { %11 = vsyncpa [#allocation7], 0 }
   0x2   :  { %12 = vsyncpa [#allocation5], 0  ;;  %s759_s18 = smov [#allocation6]   ;;  %s665_s22 = scalar_lea.hbm %s864_s1, 6144 }
   0x3   :  { %s30_s19 = sshll.u32 %s759_s18, 4  ;;  %p666_p0 = scmp.ne.s32.totalorder %s864_s1, %s665_s22  ;;  %s31_s19 = int_to_ptr.vmem [resolvable:$true] %s30_s19 }
   0x4   :  { %p669_p1 = scmp.lt.u32.totalorder %s665_s22, %s864_s1 }
   0x6   :  { %p671_p2 = pnand %p669_p1, %p666_p0 }
   0x8   :  { %674 = shalt.err (!%p671_p2)
}
   0x9   :  { %s675_s27 = scalar_lea.vmem %s31_s19, 6144  ;;  %p680_p4 = scmp.lt.s32.totalorder %s31_s19, %s31_s19 }
   0xa   :  { %p676_p3 = scmp.ne.s32.totalorder %s31_s19, %s675_s27  ;;  %p681_p5 = scmp.lt.s32.totalorder %s675_s27, %s675_s27 }
   0xc   :  { %p682_p6 = por %p681_p5, %p680_p4 }
   0xe   :  { %p683_p7 = pnand %p682_p6, %p676_p3 }
  0x10   :  { %686 = shalt.err (!%p683_p7)
}
  0x11   :  { %s760_s28 = smov 128   ;;  %s761_s29 = smov 8  }
  0x12   :  { %36 = dma.hbm_to_vmem [thread:$0]  %s864_s1, 6144, %s31_s19, [#allocation7], %s760_s28, %s760_s28, %s761_s29  }
  0x13   :  { %s762_s7 = smov [#allocation3]   ;;  %s687_s11 = scalar_lea.hbm %s863_s0, 768 }
  0x14   :  { %s18_s8 = sshll.u32 %s762_s7, 4  ;;  %p688_p8 = scmp.ne.s32.totalorder %s863_s0, %s687_s11  ;;  %s19_s8 = int_to_ptr.vmem [resolvable:$true] %s18_s8 }
  0x15   :  { %p691_p9 = scmp.lt.u32.totalorder %s687_s11, %s863_s0 }
  0x17   :  { %p693_p10 = pnand %p691_p9, %p688_p8 }
  0x19   :  { %696 = shalt.err (!%p693_p10)
}
  0x1a   :  { %s697_s16 = scalar_lea.vmem %s19_s8, 768  ;;  %p702_p12 = scmp.lt.s32.totalorder %s19_s8, %s19_s8 }
  0x1b   :  { %p698_p11 = scmp.ne.s32.totalorder %s19_s8, %s697_s16  ;;  %p703_p13 = scmp.lt.s32.totalorder %s697_s16, %s697_s16 }
  0x1d   :  { %p704_p0 = por %p703_p13, %p702_p12 }
  0x1f   :  { %p705_p1 = pnand %p704_p0, %p698_p11 }
  0x21   :  { %708 = shalt.err (!%p705_p1)
}
  0x22   :  { %s763_s1 = smov 384   ;;  %s764_s17 = smov 24  }
  0x23   :  { %24 = dma.hbm_to_vmem [thread:$0]  %s863_s0, 768, %s19_s8, [#allocation4], %s763_s1, %s763_s1, %s764_s17  }
  0x24   :  { %s765_s20 = smov [#allocation8]   ;;  %s709_s24 = scalar_lea.hbm %s866_s3, 2048 }
  0x25   :  { %s44_s21 = sshll.u32 %s765_s20, 4  ;;  %p710_p2 = scmp.ne.s32.totalorder %s866_s3, %s709_s24  ;;  %s45_s21 = int_to_ptr.vmem [resolvable:$true] %s44_s21 }
  0x26   :  { %p713_p3 = scmp.lt.u32.totalorder %s709_s24, %s866_s3 }
  0x28   :  { %p715_p4 = pnand %p713_p3, %p710_p2 }
  0x2a   :  { %718 = shalt.err (!%p715_p4)
}
  0x2b   :  { %s719_s6 = scalar_lea.vmem %s45_s21, 2048  ;;  %p724_p6 = scmp.lt.s32.totalorder %s45_s21, %s45_s21 }
  0x2c   :  { %p720_p5 = scmp.ne.s32.totalorder %s45_s21, %s719_s6  ;;  %p725_p7 = scmp.lt.s32.totalorder %s719_s6, %s719_s6 }
  0x2e   :  { %p726_p8 = por %p725_p7, %p724_p6 }
  0x30   :  { %p727_p9 = pnand %p726_p8, %p720_p5 }
  0x32   :  { %730 = shalt.err (!%p727_p9)
}
  0x33   :  { %50 = dma.hbm_to_vmem [thread:$0]  %s866_s3, 2048, %s45_s21, [#allocation7], %s760_s28, %s760_s28, %s761_s29  }
  0x34   :  { %753 = dma.done.wait [#allocation4], 768  }
  0x35   :  { %754 = vsyncadd [#allocation4], 4294966528 }
  0x36   :  { %755 = dma.done.wait [#allocation7], 8192  }
  0x37   :  { %756 = vsyncadd [#allocation7], 4294959104  ;;  %v766_v0 = vmov 0.0   ;;  %v103_v1 = vld [vmem:[#allocation6 + $0x80] sm:$0xff]  ;;  %v104_v2 = vld [vmem:[#allocation6 + $0x88] sm:$0xff]  ;;  %vm76_vm0 = vcmask 441344  }
  0x38   :  { %64 = vst [vmem:[#allocation2 + $0x10] sm:$0xff] %v766_v0  ;;  %67 = vst [vmem:[#allocation2 + $0x28] sm:$0xff] %v766_v0  ;;  %v87_v3 = vld [vmem:[#allocation6] sm:$0xff]  ;;  %v560_v4 = vpack.c.bf16 %v104_v2, %v103_v1  ;;  %v88_v5 = vld [vmem:[#allocation6 + $0x8] sm:$0xff] }
  0x39   :  { %v105_v6 = vld [vmem:[#allocation6 + $0x90] sm:$0xff]  ;;  %v106_v7 = vld [vmem:[#allocation6 + $0x98] sm:$0xff]  ;;  %v562_v8 = vpack.c.bf16 %v88_v5, %v87_v3  ;;  %v119_v10 = vld [vmem:[#allocation6 + $0x100] sm:$0xff] }
  0x3a   :  { %v564_v9 = vpack.c.bf16 %v106_v7, %v105_v6  ;;  %v120_v11 = vld [vmem:[#allocation6 + $0x108] sm:$0xff]  ;;  %v89_v12 = vld [vmem:[#allocation6 + $0x10] sm:$0xff]  ;;  %561 = vmatprep.subr.bf16.mxu0 %v560_v4  ;;  %v90_v14 = vld [vmem:[#allocation6 + $0x18] sm:$0xff] }
  0x3b   :  { %v592_v13 = vpack.c.bf16 %v120_v11, %v119_v10  ;;  %v107_v15 = vld [vmem:[#allocation6 + $0xa0] sm:$0xff]  ;;  %v108_v16 = vld [vmem:[#allocation6 + $0xa8] sm:$0xff]  ;;  %563 = vmatpush3.bf16.msra.mxu0 %v562_v8  ;;  %v566_v17 = vpack.c.bf16 %v90_v14, %v89_v12  ;;  %v121_v18 = vld [vmem:[#allocation6 + $0x110] sm:$0xff] }
  0x3c   :  { %v122_v19 = vld [vmem:[#allocation6 + $0x118] sm:$0xff]  ;;  %565 = vmatprep.subr.bf16.mxu0 %v564_v9  ;;  %v568_v20 = vpack.c.bf16 %v108_v16, %v107_v15  ;;  %v91_v22 = vld [vmem:[#allocation6 + $0x20] sm:$0xff]  ;;  %v92_v23 = vld [vmem:[#allocation6 + $0x28] sm:$0xff] }
  0x3d   :  { %593 = vmatprep.subr.bf16.mxu1 %v592_v13  ;;  %v596_v21 = vpack.c.bf16 %v122_v19, %v121_v18  ;;  %v109_v24 = vld [vmem:[#allocation6 + $0xb0] sm:$0xff]  ;;  %v110_v25 = vld [vmem:[#allocation6 + $0xb8] sm:$0xff]  ;;  %v123_v26 = vld [vmem:[#allocation6 + $0x120] sm:$0xff]  ;;  %v570_v29 = vpack.c.bf16 %v92_v23, %v91_v22 }
  0x3e   :  { %595 = vmatpush3.bf16.msra.mxu1 %v592_v13  ;;  %v124_v27 = vld [vmem:[#allocation6 + $0x128] sm:$0xff]  ;;  %v125_v30 = vld [vmem:[#allocation6 + $0x130] sm:$0xff]  ;;  %v126_v31 = vld [vmem:[#allocation6 + $0x138] sm:$0xff]  ;;  %v572_v32 = vpack.c.bf16 %v110_v25, %v109_v24 }
  0x3f   :  { %597 = vmatprep.subr.bf16.mxu1 %v596_v21  ;;  %v600_v28 = vpack.c.bf16 %v124_v27, %v123_v26  ;;  %567 = vmatpush3.bf16.msra.mxu0 %v566_v17  ;;  %v93_v33 = vld [vmem:[#allocation6 + $0x30] sm:$0xff]  ;;  %v94_v34 = vld [vmem:[#allocation6 + $0x38] sm:$0xff]  ;;  %v111_v35 = vld [vmem:[#allocation6 + $0xc0] sm:$0xff]  ;;  %v604_v37 = vpack.c.bf16 %v126_v31, %v125_v30 }
  0x40   :  { %569 = vmatprep.subr.bf16.mxu0 %v568_v20  ;;  %v112_v36 = vld [vmem:[#allocation6 + $0xc8] sm:$0xff]  ;;  %v574_v38 = vpack.c.bf16 %v94_v34, %v93_v33  ;;  %v127_v39 = vld [vmem:[#allocation6 + $0x140] sm:$0xff]  ;;  %v113_v44 = vld [vmem:[#allocation6 + $0xd0] sm:$0xff] }
  0x41   :  { %v128_v40 = vld [vmem:[#allocation6 + $0x148] sm:$0xff]  ;;  %v576_v41 = vpack.c.bf16 %v112_v36, %v111_v35  ;;  %v95_v42 = vld [vmem:[#allocation6 + $0x40] sm:$0xff]  ;;  %v114_v45 = vld [vmem:[#allocation6 + $0xd8] sm:$0xff] }
  0x42   :  { %599 = vmatpush3.bf16.msra.mxu1 %v596_v21  ;;  %v96_v43 = vld [vmem:[#allocation6 + $0x48] sm:$0xff]  ;;  %v608_v46 = vpack.c.bf16 %v128_v40, %v127_v39  ;;  %v97_v47 = vld [vmem:[#allocation6 + $0x50] sm:$0xff]  ;;  %v98_v48 = vld [vmem:[#allocation6 + $0x58] sm:$0xff]  ;;  %v580_v55 = vpack.c.bf16 %v114_v45, %v113_v44 }
  0x43   :  { %601 = vmatprep.subr.bf16.mxu1 %v600_v28  ;;  %571 = vmatpush3.bf16.msra.mxu0 %v570_v29  ;;  %v69_v49 = vld [vmem:[#allocation3 + $0x8] sm:$0xff]  ;;  %v68_v50 = vld [vmem:[#allocation3] sm:$0xff]  ;;  %v578_v51 = vpack.c.bf16 %v96_v43, %v95_v42  ;;  %v70_v56 = vld [vmem:[#allocation3 + $0x10] sm:$0xff]  ;;  %v582_v62 = vpack.c.bf16 %v98_v48, %v97_v47 }
  0x44   :  { %573 = vmatprep.subr.bf16.mxu0 %v572_v32  ;;  %v129_v52 = vld [vmem:[#allocation6 + $0x150] sm:$0xff]  ;;  %v130_v53 = vld [vmem:[#allocation6 + $0x158] sm:$0xff]  ;;  %206 = vmatprep.mubr.f32.mxu0 %v69_v49  ;;  %v71_v57 = vld [vmem:[#allocation3 + $0x18] sm:$0xff]  ;;  %77 = vst.msk [vmem:[#allocation2 + $0x10] sm:$0xff] %vm76_vm0, %v70_v56 }
  0x45   :  { %v72_v54 = vld [vmem:[#allocation3 + $0x20] sm:$0xff]  ;;  %v73_v58 = vld [vmem:[#allocation3 + $0x28] sm:$0xff]  ;;  %v115_v59 = vld [vmem:[#allocation6 + $0xe0] sm:$0xff]  ;;  %v612_v61 = vpack.c.bf16 %v130_v53, %v129_v52 }
  0x46   :  { %603 = vmatpush3.bf16.msra.mxu1 %v600_v28  ;;  %v116_v60 = vld [vmem:[#allocation6 + $0xe8] sm:$0xff]  ;;  %80 = vst.msk [vmem:[#allocation2 + $0x28] sm:$0xff] %vm76_vm0, %v73_v58  ;;  %v131_v63 = vld [vmem:[#allocation6 + $0x160] sm:$0xff]  ;;  %v117_v4 = vld [vmem:[#allocation6 + $0xf0] sm:$0xff] }
  0x47   :  { %605 = vmatprep.subr.bf16.mxu1 %v604_v37  ;;  %575 = vmatpush3.bf16.msra.mxu0 %v574_v38  ;;  %v132_v0 = vld [vmem:[#allocation6 + $0x168] sm:$0xff]  ;;  %v584_v1 = vpack.c.bf16 %v116_v60, %v115_v59  ;;  %v99_v2 = vld [vmem:[#allocation6 + $0x60] sm:$0xff]  ;;  %v118_v5 = vld [vmem:[#allocation6 + $0xf8] sm:$0xff] }
  0x48   :  { %577 = vmatprep.subr.bf16.mxu0 %v576_v41  ;;  %v100_v3 = vld [vmem:[#allocation6 + $0x68] sm:$0xff]  ;;  %v616_v6 = vpack.c.bf16 %v132_v0, %v131_v63  ;;  %v133_v8 = vld [vmem:[#allocation6 + $0x170] sm:$0xff]  ;;  %v134_v9 = vld [vmem:[#allocation6 + $0x178] sm:$0xff]  ;;  %v588_v10 = vpack.c.bf16 %v118_v5, %v117_v4 }
  0x49   :  { %v586_v7 = vpack.c.bf16 %v100_v3, %v99_v2  ;;  %v101_v11 = vld [vmem:[#allocation6 + $0x70] sm:$0xff]  ;;  %v102_v12 = vld [vmem:[#allocation6 + $0x78] sm:$0xff]  ;;  %v294_v14 = vld [vmem:[#allocation8] sm:$0xff]  ;;  %v620_v16 = vpack.c.bf16 %v134_v9, %v133_v8 }
  0x4a   :  { %607 = vmatpush3.bf16.msra.mxu1 %v604_v37  ;;  %v295_v15 = vld [vmem:[#allocation8 + $0x8] sm:$0xff]  ;;  %v590_v17 = vpack.c.bf16 %v102_v12, %v101_v11  ;;  %v296_v19 = vld [vmem:[#allocation8 + $0x10] sm:$0xff]  ;;  %v297_v20 = vld [vmem:[#allocation8 + $0x18] sm:$0xff] }
  0x4b   :  { %609 = vmatprep.subr.bf16.mxu1 %v608_v46  ;;  %579 = vmatpush3.bf16.msra.mxu0 %v578_v51  ;;  %v83_v13 = vld [vmem:[#allocation2 + $0x10] sm:$0xff]  ;;  %v624_v18 = vpack.c.bf16 %v295_v15, %v294_v14  ;;  %v628_v21 = vpack.c.bf16 %v297_v20, %v296_v19  ;;  %v298_v23 = vld [vmem:[#allocation8 + $0x20] sm:$0xff]  ;;  %v299_v24 = vld [vmem:[#allocation8 + $0x28] sm:$0xff] }
  0x4c   :  { %581 = vmatprep.subr.bf16.mxu0 %v580_v55  ;;  %522 = vmatprep.mubr.f32.mxu1 %v83_v13  ;;  %v632_v25 = vpack.c.bf16 %v299_v24, %v298_v23  ;;  %v300_v26 = vld [vmem:[#allocation8 + $0x30] sm:$0xff]  ;;  %v301_v27 = vld [vmem:[#allocation8 + $0x38] sm:$0xff]  ;;  %v302_v29 = vld [vmem:[#allocation8 + $0x40] sm:$0xff] }
  0x4d   :  { %v86_v22 = vld [vmem:[#allocation2 + $0x28] sm:$0xff]  ;;  %v636_v28 = vpack.c.bf16 %v301_v27, %v300_v26  ;;  %v304_v32 = vld [vmem:[#allocation8 + $0x50] sm:$0xff]  ;;  %v305_v33 = vld [vmem:[#allocation8 + $0x58] sm:$0xff] }
  0x4e   :  { %611 = vmatpush3.bf16.msra.mxu1 %v608_v46  ;;  %v303_v30 = vld [vmem:[#allocation8 + $0x48] sm:$0xff]  ;;  %v644_v34 = vpack.c.bf16 %v305_v33, %v304_v32  ;;  %v306_v35 = vld [vmem:[#allocation8 + $0x60] sm:$0xff]  ;;  %v308_v38 = vld [vmem:[#allocation8 + $0x70] sm:$0xff] }
  0x4f   :  { %613 = vmatprep.subr.bf16.mxu1 %v612_v61  ;;  %583 = vmatpush3.bf16.msra.mxu0 %v582_v62  ;;  %v640_v31 = vpack.c.bf16 %v303_v30, %v302_v29  ;;  %v307_v36 = vld [vmem:[#allocation8 + $0x68] sm:$0xff]  ;;  %v309_v39 = vld [vmem:[#allocation8 + $0x78] sm:$0xff]  ;;  %v414_v43 = vld [vmem:[%s865_s2] ss:$0 sm:$0xff]  ;;  %s767_s2 = smov [#allocation9]  }
  0x50   :  { %585 = vmatprep.subr.bf16.mxu0 %v584_v1  ;;  %v648_v37 = vpack.c.bf16 %v307_v36, %v306_v35  ;;  %v652_v40 = vpack.c.bf16 %v309_v39, %v308_v38  ;;  %v415_v56 = vld [vmem:[%s867_s4] ss:$0 sm:$0xff]  ;;  %s401_s11 = sshll.u32 %s767_s2, 4  ;;  %s402_s11 = int_to_ptr.vmem [resolvable:$true] %s401_s11 }
  0x51   :  { %s731_s12 = scalar_lea.vmem %s402_s11, 256  ;;  %p736_p11 = scmp.lt.s32.totalorder %s402_s11, %s402_s11 }
  0x52   :  { %615 = vmatpush3.bf16.msra.mxu1 %v612_v61  ;;  %p732_p10 = scmp.ne.s32.totalorder %s402_s11, %s731_s12  ;;  %p737_p12 = scmp.lt.s32.totalorder %s731_s12, %s731_s12 }
  0x53   :  { %617 = vmatprep.subr.bf16.mxu1 %v616_v6  ;;  %587 = vmatpush3.bf16.msra.mxu0 %v586_v7 }
  0x54   :  { %589 = vmatprep.subr.bf16.mxu0 %v588_v10  ;;  %p738_p13 = por %p737_p12, %p736_p11 }
  0x56   :  { %619 = vmatpush3.bf16.msra.mxu1 %v616_v6  ;;  %p739_p0 = pnand %p738_p13, %p732_p10 }
  0x57   :  { %621 = vmatprep.subr.bf16.mxu1 %v620_v16  ;;  %591 = vmatpush3.bf16.msra.mxu0 %v590_v17 }
  0x58   :  { %625 = vmatprep.subr.bf16.mxu0 %v624_v18 }
  0x5a   :  { %623 = vmatpush3.bf16.msra.mxu1 %v620_v16  ;;  %207 = vmatmul.mubr.f32.vlgmr.msra.gmra.mrb[0].mxu0 %v68_v50 }
  0x5b   :  { %211 = vmatprep.mubr.f32.mxu0 %v72_v54  ;;  %627 = vmatpush3.bf16.msra.mxu0 %v624_v18 }
  0x5c   :  { %629 = vmatprep.subr.bf16.mxu0 %v628_v21 }
  0x5d   :  { %523 = vmatmul.mubr.f32.vlgmr.msra.gmra.mrb[0].mxu1 %v86_v22 }
  0x5e   :  { %212 = vmatmul.mubr.f32.gmra.mrb[2].mxu0 %v71_v57 }
  0x5f   :  { %631 = vmatpush3.bf16.msra.mxu0 %v628_v21 }
  0x60   :  { %633 = vmatprep.subr.bf16.mxu0 %v632_v25 }
  0x63   :  { %635 = vmatpush3.bf16.msra.mxu0 %v632_v25 }
  0x64   :  { %637 = vmatprep.subr.bf16.mxu0 %v636_v28 }
  0x67   :  { %639 = vmatpush3.bf16.msra.mxu0 %v636_v28 }
  0x68   :  { %641 = vmatprep.subr.bf16.mxu0 %v640_v31 }
  0x6b   :  { %643 = vmatpush3.bf16.msra.mxu0 %v640_v31 }
  0x6c   :  { %645 = vmatprep.subr.bf16.mxu0 %v644_v34 }
  0x6f   :  { %647 = vmatpush3.bf16.msra.mxu0 %v644_v34 }
  0x70   :  { %649 = vmatprep.subr.bf16.mxu0 %v648_v37 }
  0x73   :  { %651 = vmatpush3.bf16.msra.mxu0 %v648_v37 }
  0x74   :  { %653 = vmatprep.subr.bf16.mxu0 %v652_v40 }
  0x77   :  { %655 = vmatpush3.bf16.msra.mxu0 %v652_v40 }
 0x12d   :  { %v448_v41 = vpop.f32.mrb[0].mxu0 }
 0x12e   :  { %v449_v42 = vpop.f32.mrb[1].mxu0 }
 0x12f   :  { %v450_v44 = vadd.f32 %v449_v42, %v448_v41 }
 0x130   :  { %v524_v45 = vpop.f32.mrb[0].mxu1 }
 0x131   :  { %v283_v46 = vpop.f32.mrb[1].mxu1  ;;  %v451_v47 = vpop.f32.mrb[2].mxu0  ;;  %v209_v48 = vadd.f32 %v450_v44, %v414_v43 }
 0x132   :  { %v452_v49 = vpop.f32.mrb[3].mxu0 }
 0x133   :  { %v453_v50 = vadd.f32 %v452_v49, %v451_v47  ;;  %v284_v51 = vadd.f32 %v283_v46, %v209_v48 }
 0x135   :  { %v214_v52 = vadd.f32 %v453_v50, %v414_v43  ;;  %v292_v53 = vmax.f32 %v284_v51, 0.0 }
 0x137   :  { %v289_v54 = vadd.f32 %v524_v45, %v214_v52  ;;  %557 = vmatprep.mubr.f32.mxu0 %v292_v53 }
 0x139   :  { %v293_v55 = vmax.f32 %v289_v54, 0.0 }
 0x13b   :  { %558 = vmatmul.mubr.f32.vlgmr.msra.gmra.mrb[4].mxu0 %v293_v55 }
 0x20e   :  { %v559_v57 = vpop.f32.mrb[4].mxu0 }
 0x20f   :  { %v389_v58 = vadd.f32 %v559_v57, %v415_v56  ;;  %v383_v59 = vpop.f32.mrb[5].mxu0 }
 0x210   :  { %v384_v60 = vadd.f32 %v415_v56, %v383_v59 }
 0x211   :  { %v393_v61 = vmax.f32 %v389_v58, 0.0 }
 0x212   :  { %v392_v62 = vmax.f32 %v384_v60, 0.0 }
 0x213   :  { %395 = vst [vmem:[#allocation9 + $0x8] sm:$0xff] %v393_v61 }
 0x214   :  { %394 = vst [vmem:[#allocation9] sm:$0xff] %v392_v62 }
 0x215   :  { %742 = shalt.err (!%p739_p0)
}
 0x216   :  { %s743_s14 = scalar_lea.hbm %s868_s5, 256 }
 0x217   :  { %p744_p1 = scmp.ne.s32.totalorder %s868_s5, %s743_s14  ;;  %p747_p2 = scmp.lt.u32.totalorder %s743_s14, %s868_s5 }
 0x219   :  { %p749_p3 = pnand %p747_p2, %p744_p1 }
 0x21b   :  { %752 = shalt.err (!%p749_p3)
}
 0x21c   :  { %407 = dma.vmem_to_hbm [thread:$0]  %s402_s11, 256, %s868_s5, [#allocation5], %s760_s28, %s760_s28, %s761_s29  }
 0x21d   :  { %757 = dma.done.wait [#allocation5], 256  }
 0x21e   :  { %758 = vsyncadd [#allocation5], 4294967040 }
 0x21f   :  { %411 = vsyncpa [#allocation4], 1 }
 0x220   :  { %412 = vsyncpa [#allocation7], 1 }
 0x221   :  { %413 = vsyncpa [#allocation5], 1 }

</bundles_post_ra>
